<compile_context>
chip_gen: v7x
topology: tpu7x:2x2x1
jax: 0.10.0
libtpu: 0.0.40
codegen_flags: <defaults>
</compile_context>

<pallas_src>
import functools

import jax
import jax.numpy as jnp
import numpy as np
from jax.experimental import pallas as pl
from jax.experimental.pallas import tpu as pltpu

_BIG = 1e30  # distance assigned to padded codebook slots (never wins argmin)


def _round_up(x, m):
    return (x + m - 1) // m * m


def dkvb_kernel(x_ref, a_ref, c2_ref, val_ref, out_ref, *, num_heads, m_pad):
    """One grid step = one (batch, seq-tile) block.

    x_ref:   (1, TN, De)        input embeddings tile
    a_ref:   (De, H*Mp)         fused score weights  W_h @ codebook_h^T  (lane-padded per head)
    c2_ref:  (1, H*Mp)          0.5*||c||^2 per code (+BIG on padded codes)
    val_ref: (H*Mp, Dm_pad)     flattened value memories (zero-padded)
    out_ref: (1, TN, Dm_pad)    head-averaged gathered memories
    """
    xb = x_ref[0]                                                   # (TN, De)
    tn = xb.shape[0]

    # --- projection + per-head code scores in ONE MXU matmul -----------------
    scores = jnp.dot(xb, a_ref[...], preferred_element_type=jnp.float32)  # (TN, H*Mp)

    # distance surrogate: 0.5*||c||^2 - z.c  (argmin-equivalent to ||z-c||^2)
    d = c2_ref[...] - scores                                        # (TN, H*Mp)

    # --- per-head argmin + one-hot build (lane-aligned 128-wide slices) ------
    iota = jax.lax.broadcasted_iota(jnp.int32, (tn, m_pad), 1)      # (TN, Mp)
    inv_h = 1.0 / num_heads
    onehots = []
    for h in range(num_heads):                                      # H small & static
        d_h = d[:, h * m_pad:(h + 1) * m_pad]                       # (TN, Mp)
        dmin = jnp.min(d_h, axis=-1, keepdims=True)                 # (TN, 1)
        # first index achieving the minimum (matches torch argmin tie-breaking)
        idx = jnp.min(jnp.where(d_h == dmin, iota, m_pad),
                      axis=-1, keepdims=True)                       # (TN, 1)
        # fold the 1/H head-average into the one-hot value
        onehots.append(jnp.where(iota == idx, inv_h, 0.0).astype(jnp.float32))

    onehot = jnp.concatenate(onehots, axis=-1)                      # (TN, H*Mp)

    # --- gather + head-average in ONE MXU matmul ------------------------------
    out_ref[0] = jnp.dot(onehot, val_ref[...],
                         preferred_element_type=jnp.float32).astype(out_ref.dtype)


def dkvb_forward(x, rand_proj, codebooks, values, *, seq_tile=256):
    B, N, De = x.shape
    H, De2, Dc = rand_proj.shape
    assert De2 == De
    M = codebooks.shape[1]
    Dm = values.shape[2]

    Mp = _round_up(M, 128)        # lane-dense codebook axis
    Dmp = _round_up(Dm, 128)      # lane-dense output axis (unmasked stores)
    TN = min(seq_tile, _round_up(N, 8))
    Np = _round_up(N, TN)

    f32 = jnp.float32
    x32 = jnp.pad(x.astype(f32), ((0, 0), (0, Np - N), (0, 0)))     # (B, Np, De)

    # Fold the random projection into the score weights (grid-invariant precompute):
    #   score[n, h, m] = <x[n] @ W_h, c_{h,m}> = x[n] . (W_h @ c_{h,m})
    A = jnp.einsum('hde,hme->hdm', rand_proj.astype(f32), codebooks.astype(f32))  # (H, De, M)
    A = jnp.pad(A, ((0, 0), (0, 0), (0, Mp - M)))                   # zero-pad codes
    A = jnp.transpose(A, (1, 0, 2)).reshape(De, H * Mp)             # (De, H*Mp)

    c2 = 0.5 * jnp.sum(codebooks.astype(f32) ** 2, axis=-1)         # (H, M)
    c2 = jnp.pad(c2, ((0, 0), (0, Mp - M)), constant_values=_BIG)
    c2 = c2.reshape(1, H * Mp)

    vals = jnp.pad(values.astype(f32), ((0, 0), (0, Mp - M), (0, Dmp - Dm)))
    vals = vals.reshape(H * Mp, Dmp)                                # (H*Mp, Dm_pad)

    kernel = functools.partial(dkvb_kernel, num_heads=H, m_pad=Mp)

    out = pl.pallas_call(
        kernel,
        out_shape=jax.ShapeDtypeStruct((B, Np, Dmp), x.dtype),
        grid_spec=pltpu.PrefetchScalarGridSpec(
            num_scalar_prefetch=0,
            grid=(B, Np // TN),
            in_specs=[
                pl.BlockSpec((1, TN, De), lambda b, n: (b, n, 0)),
                pl.BlockSpec((De, H * Mp), lambda b, n: (0, 0)),
                pl.BlockSpec((1, H * Mp), lambda b, n: (0, 0)),
                pl.BlockSpec((H * Mp, Dmp), lambda b, n: (0, 0)),
            ],
            out_specs=pl.BlockSpec((1, TN, Dmp), lambda b, n: (b, n, 0)),
        ),
        compiler_params=pltpu.CompilerParams(
            dimension_semantics=("parallel", "parallel"),
            vmem_limit_bytes=64 * 1024 * 1024,
        ),
    )(x32, A, c2, vals)

    return out[:, :N, :Dm]


def dkvb_reference(x, rand_proj, codebooks, values):
    """Pure-JAX reference of the PyTorch forward (encoder=None, avg pool=True)."""
    H = rand_proj.shape[0]
    z = jnp.einsum('bnd,cde->bnce', x, rand_proj)                            # (B,N,H,Dc)
    d = jnp.sum((z[:, :, :, None, :] - codebooks[None, None]) ** 2, -1)      # (B,N,H,M)
    idx = jnp.argmin(d, axis=-1)                                             # (B,N,H)
    mem = values[jnp.arange(H)[None, None, :], idx]                          # (B,N,H,Dm)
    return jnp.mean(mem, axis=2)                                             # (B,N,Dm)


if __name__ == "__main__":
    # small, forward-consistent shapes
    B, N = 2, 8                 # batch, sequence
    dim_embed = 32              # input embedding dim
    dim = 16                    # per-head projected / codebook dim
    H = 2                       # num_memory_codebooks (VQ heads)
    M = 64                      # num_memories (codebook size)
    dim_memory = 16             # value dim

    key = jax.random.PRNGKey(0)
    kx, kp, kc, kv = jax.random.split(key, 4)

    x = jax.random.normal(kx, (B, N, dim_embed), dtype=jnp.float32)

    # rand_proj buffer: xavier_normal_ on (H, dim_embed, dim)
    xavier_std = float(np.sqrt(2.0 / (dim_embed + dim)))
    rand_proj = xavier_std * jax.random.normal(kp, (H, dim_embed, dim), dtype=jnp.float32)

    # VQ codebooks (separate per head), deterministic synthetic init
    codebooks = jax.random.normal(kc, (H, M, dim), dtype=jnp.float32)

    # values parameter: randn(num_memory_codebooks, num_memories, dim_memory)
    values = jax.random.normal(kv, (H, M, dim_memory), dtype=jnp.float32)

    out = dkvb_forward(x, rand_proj, codebooks, values)
    out = jax.block_until_ready(out)

    ref = dkvb_reference(x, rand_proj, codebooks, values)
    np.testing.assert_allclose(np.asarray(out), np.asarray(ref), rtol=1e-5, atol=1e-5)

    print("KERNEL_OK")
</pallas_src>

<mosaic_0001>
module attributes {stable_mosaic.version = 11 : i64} {
  func.func @dkvb_kernel(%arg0: i32, %arg1: i32, %arg2: memref<1x8x32xf32, #tpu.memory_space<vmem>>, %arg3: memref<32x256xf32, #tpu.memory_space<vmem>>, %arg4: memref<1x256xf32, #tpu.memory_space<vmem>>, %arg5: memref<256x128xf32, #tpu.memory_space<vmem>>, %arg6: memref<1x8x128xf32, #tpu.memory_space<vmem>>) attributes {dimension_semantics = [#tpu.dimension_semantics<parallel>, #tpu.dimension_semantics<parallel>], iteration_bounds = array<i64: 2, 1>, scalar_prefetch = 0 : i64, scratch_operands = 0 : i64, tpu.core_type = #tpu.core_type<tc>, window_params = [{transform_indices = @transform_0, window_bounds = array<i64: 1, 8, 32>}, {pipeline_mode = #tpu.pipeline_mode<synchronous>, transform_indices = @transform_1, window_bounds = array<i64: 32, 256>}, {pipeline_mode = #tpu.pipeline_mode<synchronous>, transform_indices = @transform_2, window_bounds = array<i64: 1, 256>}, {pipeline_mode = #tpu.pipeline_mode<synchronous>, transform_indices = @transform_3, window_bounds = array<i64: 256, 128>}, {transform_indices = @transform_4, window_bounds = array<i64: 1, 8, 128>}]} {
    %c0 = arith.constant 0 : index
    %c0_0 = arith.constant 0 : index
    %c0_1 = arith.constant 0 : index
    %0 = vector.load %arg2[%c0, %c0_0, %c0_1] : memref<1x8x32xf32, #tpu.memory_space<vmem>>, vector<1x8x32xf32>
    %1 = vector.shape_cast %0 : vector<1x8x32xf32> to vector<8x32xf32>
    %c0_2 = arith.constant 0 : index
    %c0_3 = arith.constant 0 : index
    %2 = vector.load %arg3[%c0_2, %c0_3] : memref<32x256xf32, #tpu.memory_space<vmem>>, vector<32x256xf32>
    %cst = arith.constant dense<0.000000e+00> : vector<8x256xf32>
    %3 = tpu.matmul %1, %2, %cst {dimension_numbers = #tpu.dot_dimension_numbers<[1], [0], [0], [1], [0, 0, 1, 1], [], []>} : vector<8x32xf32>, vector<32x256xf32>, vector<8x256xf32> -> vector<8x256xf32>
    %c0_4 = arith.constant 0 : index
    %c0_5 = arith.constant 0 : index
    %4 = vector.load %arg4[%c0_4, %c0_5] : memref<1x256xf32, #tpu.memory_space<vmem>>, vector<1x256xf32>
    %5 = vector.broadcast %4 : vector<1x256xf32> to vector<8x256xf32>
    %6 = arith.subf %5, %3 : vector<8x256xf32>
    %7 = tpu.iota {dimensions = array<i32: 1>} : vector<8x128xi32>
    %8 = vector.extract_strided_slice %6 {offsets = [0, 0], sizes = [8, 128], strides = [1, 1]} : vector<8x256xf32> to vector<8x128xf32>
    %cst_6 = arith.constant dense<0x7F800000> : vector<8xf32>
    %9 = vector.multi_reduction <minimumf>, %8, %cst_6 [1] : vector<8x128xf32> to vector<8xf32>
    %10 = vector.shape_cast %9 : vector<8xf32> to vector<8x1xf32>
    %11 = vector.broadcast %10 : vector<8x1xf32> to vector<8x128xf32>
    %12 = arith.cmpf oeq, %8, %11 : vector<8x128xf32>
    %c128_i32 = arith.constant 128 : i32
    %13 = vector.broadcast %c128_i32 : i32 to vector<8x128xi32>
    %14 = arith.select %12, %7, %13 : vector<8x128xi1>, vector<8x128xi32>
    %cst_7 = arith.constant dense<2147483647> : vector<8xi32>
    %15 = vector.multi_reduction <minsi>, %14, %cst_7 [1] : vector<8x128xi32> to vector<8xi32>
    %16 = vector.shape_cast %15 : vector<8xi32> to vector<8x1xi32>
    %17 = vector.broadcast %16 : vector<8x1xi32> to vector<8x128xi32>
    %18 = arith.cmpi eq, %7, %17 : vector<8x128xi32>
    %cst_8 = arith.constant 5.000000e-01 : f32
    %cst_9 = arith.constant 0.000000e+00 : f32
    %19 = vector.broadcast %cst_8 : f32 to vector<8x128xf32>
    %20 = vector.broadcast %cst_9 : f32 to vector<8x128xf32>
    %21 = arith.select %18, %19, %20 : vector<8x128xi1>, vector<8x128xf32>
    %22 = vector.extract_strided_slice %6 {offsets = [0, 128], sizes = [8, 128], strides = [1, 1]} : vector<8x256xf32> to vector<8x128xf32>
    %cst_10 = arith.constant dense<0x7F800000> : vector<8xf32>
    %23 = vector.multi_reduction <minimumf>, %22, %cst_10 [1] : vector<8x128xf32> to vector<8xf32>
    %24 = vector.shape_cast %23 : vector<8xf32> to vector<8x1xf32>
    %25 = vector.broadcast %24 : vector<8x1xf32> to vector<8x128xf32>
    %26 = arith.cmpf oeq, %22, %25 : vector<8x128xf32>
    %c128_i32_11 = arith.constant 128 : i32
    %27 = vector.broadcast %c128_i32_11 : i32 to vector<8x128xi32>
    %28 = arith.select %26, %7, %27 : vector<8x128xi1>, vector<8x128xi32>
    %cst_12 = arith.constant dense<2147483647> : vector<8xi32>
    %29 = vector.multi_reduction <minsi>, %28, %cst_12 [1] : vector<8x128xi32> to vector<8xi32>
    %30 = vector.shape_cast %29 : vector<8xi32> to vector<8x1xi32>
    %31 = vector.broadcast %30 : vector<8x1xi32> to vector<8x128xi32>
    %32 = arith.cmpi eq, %7, %31 : vector<8x128xi32>
    %cst_13 = arith.constant 5.000000e-01 : f32
    %cst_14 = arith.constant 0.000000e+00 : f32
    %33 = vector.broadcast %cst_13 : f32 to vector<8x128xf32>
    %34 = vector.broadcast %cst_14 : f32 to vector<8x128xf32>
    %35 = arith.select %32, %33, %34 : vector<8x128xi1>, vector<8x128xf32>
    %36 = tpu.concatenate %21, %35 in 1 : vector<8x128xf32>, vector<8x128xf32> -> vector<8x256xf32>
    %c0_15 = arith.constant 0 : index
    %c0_16 = arith.constant 0 : index
    %37 = vector.load %arg5[%c0_15, %c0_16] : memref<256x128xf32, #tpu.memory_space<vmem>>, vector<256x128xf32>
    %cst_17 = arith.constant dense<0.000000e+00> : vector<8x128xf32>
    %38 = tpu.matmul %36, %37, %cst_17 {dimension_numbers = #tpu.dot_dimension_numbers<[1], [0], [0], [1], [0, 0, 1, 1], [], []>} : vector<8x256xf32>, vector<256x128xf32>, vector<8x128xf32> -> vector<8x128xf32>
    %c0_18 = arith.constant 0 : index
    %c0_19 = arith.constant 0 : index
    %c0_20 = arith.constant 0 : index
    %39 = vector.load %arg6[%c0_18, %c0_19, %c0_20] : memref<1x8x128xf32, #tpu.memory_space<vmem>>, vector<1x8x128xf32>
    %40 = vector.shape_cast %39 : vector<1x8x128xf32> to vector<8x128xf32>
    %41 = vector.shape_cast %38 : vector<8x128xf32> to vector<1x8x128xf32>
    tpu.vector_store %arg6[%c0_18, %c0_19, %c0_20], %41 {strides = array<i32>} : memref<1x8x128xf32, #tpu.memory_space<vmem>>, vector<1x8x128xf32>,
    return
  }
  func.func @transform_0(%arg0: i32, %arg1: i32) -> (i32, i32, i32) {
    %c0_i32 = arith.constant 0 : i32
    %c0_i32_0 = arith.constant 0 : i32
    return %arg0, %arg1, %c0_i32 : i32, i32, i32
  }
  func.func @transform_1(%arg0: i32, %arg1: i32) -> (i32, i32) {
    %c0_i32 = arith.constant 0 : i32
    %c0_i32_0 = arith.constant 0 : i32
    %c0_i32_1 = arith.constant 0 : i32
    return %c0_i32, %c0_i32_0 : i32, i32
  }
  func.func @transform_2(%arg0: i32, %arg1: i32) -> (i32, i32) {
    %c0_i32 = arith.constant 0 : i32
    %c0_i32_0 = arith.constant 0 : i32
    %c0_i32_1 = arith.constant 0 : i32
    return %c0_i32, %c0_i32_0 : i32, i32
  }
  func.func @transform_3(%arg0: i32, %arg1: i32) -> (i32, i32) {
    %c0_i32 = arith.constant 0 : i32
    %c0_i32_0 = arith.constant 0 : i32
    %c0_i32_1 = arith.constant 0 : i32
    return %c0_i32, %c0_i32_0 : i32, i32
  }
  func.func @transform_4(%arg0: i32, %arg1: i32) -> (i32, i32, i32) {
    %c0_i32 = arith.constant 0 : i32
    %c0_i32_0 = arith.constant 0 : i32
    return %arg0, %arg1, %c0_i32 : i32, i32, i32
  }
}

</mosaic_0001>

<bundles_post_ra>
// kernel: tpu_custom_call.1
= control target key start
LH: loop header
LB: loop body
LE: loop exit
PB: predicated region body
PF: predicated region fallthrough
CT: control target
= control target key end

     0   :  { %9 = vsyncpa [#allocation3], 0  ;;  %s1362_s0 = inlined_call_operand.hbm [shape: f32[2,8,32], index: 0, kind: input, shape index: {}]   ;;  %s1363_s1 = inlined_call_operand.hbm [shape: f32[32,256], index: 1, kind: input, shape index: {}]   ;;  %s1364_s2 = inlined_call_operand.hbm [shape: f32[1,256], index: 2, kind: input, shape index: {}]   ;;  %s1365_s3 = inlined_call_operand.hbm [shape: f32[256,128], index: 3, kind: input, shape index: {}]   ;;  %s1366_s4 = inlined_call_operand.hbm [shape: f32[2,8,128], index: 4, kind: output, shape index: {}]  }
   0x1   :  { %11 = vsyncpa [#allocation3 + $0x1], 0 }
   0x2   :  { %12 = vsyncpa [#allocation6], 0 }
   0x3   :  { %13 = vsyncpa [#allocation9], 0 }
   0x4   :  { %14 = vsyncpa [#allocation4], 0 }
   0x5   :  { %16 = vsyncpa [#allocation4 + $0x1], 0  ;;  %s1077_s15 = smov 0   ;;  %s1079_s16 = smov 0  }
   0x6   :  { %s1081_s17 = smov 0   ;;  %s1083_s18 = smov 0  }
   0x7   :  { %s1085_s19 = smov 0   ;;  %s1087_s20 = smov 0  }
   0x8 LB: > { %s639_s21 = sadd.s32 4294967295, %s1039_s20   ;;  %s640_s22 = sadd.s32 4294967294, %s1039_s20   ;;  %s1039_s20 = sphi %s1087_s20, %s22_s20   ;;  %s1035_s19 = sphi %s1085_s19, %s1393_s19   ;;  %s1031_s18 = sphi %s1083_s18, %s1392_s18   ;;  %s1027_s17 = sphi %s1081_s17, %s1391_s17   ;;  %s1023_s16 = sphi %s1079_s16, %s1390_s16   ;;  %s1019_s15 = sphi %s1077_s15, %s1389_s15  }
   0x9   : > { %p56_p0 = scmp.ne.s32.totalorder %s1023_s16, %s1019_s15  ;;  %p1111_p1 = scmp.eq.s32.totalorder %s639_s21, 0 }
   0xa   : > { %p1115_p2 = scmp.eq.s32.totalorder %s639_s21, 1  ;;  %p151_p3 = scmp.eq.s32.totalorder %s640_s22, 1 }
   0xb   : > { %s1372_s23 = scalar_select %p1111_p1, 1, 0 }
   0xc   : > { %s1373_s24 = scalar_select %p1115_p2, 1, 0 }
   0xd   : > { %p1121_p4 = por %p1111_p1, %p56_p0  ;;  %p641_p5 = scmp.ge.s32.totalorder %s1039_s20, 1 }
   0xe   : > { %p1126_p6 = por %p151_p3, %p56_p0  ;;  %p158_p7 = scmp.lt.s32.totalorder %s1039_s20, 3 }
   0xf   : > { %s1374_s25 = scalar_select %p1121_p4, 1, 0 }
  0x10   : > { %s1375_s26 = scalar_select %p1126_p6, 1, 0 }
  0x11   : > { %p1131_p8 = pnand %p641_p5, %p158_p7  ;;  %s1041_s28 = smov [#allocation5]  }
  0x12   : > { %1376 = sst [smem:[#allocation15_spill]] %s1375_s26  ;;  %s170_s29 = sshll.u32 %s1041_s28, 4  ;;  %s1135_s29 = int_to_ptr.vmem [resolvable:$true] %s170_s29 }
  0x13   : > { %s1377_s27 = scalar_select %p1131_p8, 1, 0 }
  0x14   : > { %p752_p9 = pneg %p1131_p8  ;;  %s1042_s5 = smov [#allocation7]  }
  0x15   : > { %s184_s6 = sshll.u32 %s1042_s5, 4  ;;  %s1043_s7 = smov [#allocation8]   ;;  %s1146_s6 = int_to_ptr.vmem [resolvable:$true] %s184_s6 }
  0x16   : > { %p1142_p11 = pnand %p752_p9, %p1111_p1  ;;  %s1148_s8 = sshll.u32 %s1043_s7, 4  ;;  %s195_s8 = int_to_ptr.vmem [resolvable:$true] %s1148_s8 }
  0x17   : > { %s835_s11 = scalar_lea.hbm %s1363_s1, 1024 }
  0x18   : > { %p836_p12 = scmp.ne.s32.totalorder %s1363_s1, %s835_s11  ;;  %p1158_p13 = pneg %p1142_p11 }
  0x19   : > { %p842_p5 = scmp.lt.u32.totalorder %s835_s11, %s1363_s1 }
  0x1a   : > { %p838_p0 = pnand %p1158_p13, %p836_p12 }
  0x1c   : > { %p839_p3 = pneg %p838_p0 }
  0x1e   : > { %p844_p7 = pnand %p842_p5, %p839_p3 }
  0x20   : > { %847 = shalt.err (!%p844_p7)
}
  0x21   : > { %s848_s28 = scalar_lea.vmem %s1135_s29, 1024  ;;  %p856_p1 = scmp.lt.s32.totalorder %s1135_s29, %s1135_s29 }
  0x22   : > { %p849_p9 = scmp.ne.s32.totalorder %s1135_s29, %s848_s28  ;;  %p857_p4 = scmp.lt.s32.totalorder %s848_s28, %s848_s28 }
  0x24   : > { %p851_p10 = pnand %p849_p9, %p1158_p13  ;;  %p858_p12 = por %p857_p4, %p856_p1 }
  0x26   : > { %p852_p6 = pneg %p851_p10 }
  0x28   : > { %p859_p0 = pnand %p858_p12, %p852_p6 }
  0x2a   : > { %862 = shalt.err (!%p859_p0)
}
  0x2b   : > { %s1044_s5 = smov 256   ;;  %s1045_s7 = smov 16  }
  0x2c   : > { %755 = dma.hbm_to_vmem [thread:$0]  (!%p1142_p11), %s1363_s1, 1024, %s1135_s29, [#allocation6], %s1044_s5, %s1044_s5, %s1045_s7  }
  0x2d   : > { %s863_s13 = scalar_lea.hbm %s1364_s2, 32 }
  0x2e   : > { %p864_p1 = scmp.ne.s32.totalorder %s1364_s2, %s863_s13  ;;  %p870_p10 = scmp.lt.u32.totalorder %s863_s13, %s1364_s2 }
  0x30   : > { %p866_p4 = pnand %p864_p1, %p1158_p13 }
  0x32   : > { %p867_p6 = pneg %p866_p4 }
  0x34   : > { %p872_p3 = pnand %p870_p10, %p867_p6 }
  0x36   : > { %875 = shalt.err (!%p872_p3)
}
  0x37   : > { %s876_s29 = scalar_lea.vmem %s1146_s6, 32  ;;  %p884_p12 = scmp.lt.s32.totalorder %s1146_s6, %s1146_s6 }
  0x38   : > { %p877_p5 = scmp.ne.s32.totalorder %s1146_s6, %s876_s29  ;;  %p885_p0 = scmp.lt.s32.totalorder %s876_s29, %s876_s29 }
  0x3a   : > { %p879_p7 = pnand %p877_p5, %p1158_p13  ;;  %p886_p1 = por %p885_p0, %p884_p12 }
  0x3c   : > { %p880_p9 = pneg %p879_p7 }
  0x3e   : > { %p887_p4 = pnand %p886_p1, %p880_p9 }
  0x40   : > { %890 = shalt.err (!%p887_p4)
}
  0x41   : > { %758 = dma.hbm_to_vmem [thread:$0]  (!%p1142_p11), %s1364_s2, 32, %s1146_s6, [#allocation6]  }
  0x42   : > { %s891_s10 = scalar_lea.hbm %s1365_s3, 4096 }
  0x43   : > { %p892_p6 = scmp.ne.s32.totalorder %s1365_s3, %s891_s10  ;;  %p898_p5 = scmp.lt.u32.totalorder %s891_s10, %s1365_s3 }
  0x45   : > { %p894_p10 = pnand %p892_p6, %p1158_p13 }
  0x47   : > { %p895_p3 = pneg %p894_p10 }
  0x49   : > { %p900_p7 = pnand %p898_p5, %p895_p3 }
  0x4b   : > { %903 = shalt.err (!%p900_p7)
}
  0x4c   : > { %s904_s22 = scalar_lea.vmem %s195_s8, 4096  ;;  %p912_p1 = scmp.lt.s32.totalorder %s195_s8, %s195_s8 }
  0x4d   : > { %p905_p9 = scmp.ne.s32.totalorder %s195_s8, %s904_s22  ;;  %p913_p4 = scmp.lt.s32.totalorder %s904_s22, %s904_s22 }
  0x4f   : > { %p907_p12 = pnand %p905_p9, %p1158_p13  ;;  %p914_p8 = por %p913_p4, %p912_p1 }
  0x51   : > { %p908_p0 = pneg %p907_p12 }
  0x53   : > { %p915_p2 = pnand %p914_p8, %p908_p0 }
  0x55   : > { %918 = shalt.err (!%p915_p2)
}
  0x56   : > { %s1046_s6 = smov 128   ;;  %s1047_s14 = smov 8  }
  0x57   : > { %761 = dma.hbm_to_vmem [thread:$0]  (!%p1142_p11), %s1365_s3, 4096, %s195_s8, [#allocation9], %s1046_s6, %s1046_s6, %s1047_s14  }
  0x58   : > { %s43_s26 = sadd.s32 1, %s1027_s17  ;;  %s34_s5 = sadd.s32 1, %s1035_s19 }
  0x59   : > { %p50_p2 = scmp.ne.s32.totalorder %s1027_s17, %s1023_s16  ;;  %p36_p8 = scmp.ge.s32.totalorder %s34_s5, 2 }
  0x5a   : > { %p51_p13 = scmp.eq.s32.totalorder %s1039_s20, 0  ;;  %p1380_p6 = scmp.ne.s32.totalorder %s1373_s24, 0 }
  0x5b   : > { %p773_p3 = scmp.lt.s32.totalorder %s1039_s20, 2  ;;  %s1395_s5 = smov (%p36_p8, %s34_s5), 0 }
  0x5c   : > { %p1228_p10 = por %p1380_p6, %p50_p2  ;;  %p52_p5 = por %p51_p13, %p50_p2 }
  0x5d   : > { %s208_s30 = sand.u32 1, %s1027_s17   ;;  %s38_s9 = ssub.s32 %s1035_s19, %s1395_s5 }
  0x5e   : > { %p41_p7 = scmp.eq.s32.totalorder %s38_s9, 0  ;;  %s646_s8 = sshll.u32 %s208_s30, 3 }
  0x5f   : > { %s647_s10 = sshll.u32 %s1035_s19, 7  ;;  %s212_s21 = scalar_lea.vmem [#allocation2], %s646_s8 }
  0x60   : > { %s1240_s11 = scalar_select %p41_p7, %s1027_s17, %s43_s26  }
  0x61   : > { %s1245_s24 = scalar_lea.hbm %s1362_s0, %s647_s10  ;;  %s220_s22 = sshll.u32 %s212_s21, 4  ;;  %s1247_s22 = int_to_ptr.vmem [resolvable:$true] %s220_s22 }
  0x62   : > { %p1251_p11 = pnand %p773_p3, %p52_p5  ;;  %s209_s14 = scalar_lea.sflag [#allocation3], %s208_s30 }
  0x63   : > { %s919_s28 = scalar_lea.hbm %s1245_s24, 128  ;;  %s924_s9 = scalar_lea.hbm %s1362_s0, 256 }
  0x64   : > { %p920_p9 = scmp.ne.s32.totalorder %s1245_s24, %s919_s28  ;;  %p921_p12 = pneg %p1251_p11 }
  0x65   : > { %p925_p4 = scmp.lt.u32.totalorder %s1245_s24, %s1362_s0  ;;  %p926_p2 = scmp.lt.u32.totalorder %s924_s9, %s919_s28 }
  0x66   : > { %p922_p0 = pnand %p921_p12, %p920_p9  ;;  %p928_p13 = scmp.lt.u32.totalorder %s919_s28, %s1245_s24 }
  0x67   : > { %p927_p8 = por %p926_p2, %p925_p4 }
  0x68   : > { %p923_p1 = pneg %p922_p0 }
  0x69   : > { %p929_p6 = por %p928_p13, %p927_p8 }
  0x6b   : > { %p930_p3 = pnand %p929_p6, %p923_p1 }
  0x6d   : > { %933 = shalt.err (!%p930_p3)
}
  0x6e   : > { %s934_s30 = scalar_lea.vmem %s1247_s22, 128  ;;  %s1048_s12 = smov [#allocation2]  }
  0x6f   : > { %p935_p5 = scmp.ne.s32.totalorder %s1247_s22, %s934_s30  ;;  %s939_s13 = sshll.u32 %s1048_s12, 4  ;;  %s940_s13 = int_to_ptr.vmem [resolvable:$false] %s939_s13 }
  0x70   : > { %s941_s21 = scalar_lea.vmem %s940_s13, 256  ;;  %p942_p0 = scmp.lt.s32.totalorder %s1247_s22, %s940_s13 }
  0x71   : > { %p937_p7 = pnand %p935_p5, %p921_p12  ;;  %p943_p4 = scmp.lt.s32.totalorder %s941_s21, %s934_s30 }
  0x73   : > { %p938_p9 = pneg %p937_p7  ;;  %p944_p2 = por %p943_p4, %p942_p0 }
  0x75   : > { %p945_p8 = pnand %p944_p2, %p938_p9 }
  0x77   : > { %948 = shalt.err (!%p945_p8)
}
  0x78   : > { %765 = dma.hbm_to_vmem [thread:$0]  (!%p1251_p11), %s1245_s24, 128, %s1247_s22, %s209_s14  }
  0x79   : > { %p1383_p1 = scmp.ne.s32.totalorder %s1377_s27, 0 }
  0x7a   : > { %s1283_s28 = sand.u32 (!%p1383_p1), 1, %s1023_s16   ;;  %p1384_p12 = scmp.ne.s32.totalorder (!%p1383_p1), %s1374_s25, 0 }
  0x7b   : > { %229 = sbr.rel (%p1383_p1) target bundleno = 1034 (0x40a), region = 36  ;;  %s649_s29 = sshll.u32 (!%p1383_p1), %s1283_s28, 3 }
  0x7c   : > { %s232_s26 = scalar_lea.sflag (!%p1383_p1), [#allocation3], %s1283_s28  ;;  %s235_s9 = scalar_lea.vmem (!%p1383_p1), [#allocation2], %s649_s29 }
  0x82   : > { %1002 = dma.done.wait (%p1384_p12), %s232_s26, 128  }
  0x83   : > { %1004 = vsyncadd (%p1384_p12), %s232_s26, 4294967168  ;;  %p1385_p11 = scmp.ne.s32.totalorder %s1372_s23, 0 }
  0x85   : > { %1006 = dma.done.wait (%p1385_p11), [#allocation6], 1056  }
  0x86   : > { %1008 = vsyncadd (%p1385_p11), [#allocation6], 4294966240 }
  0x87   : > { %1010 = dma.done.wait (%p1385_p11), [#allocation9], 4096  }
  0x88   : > { %1012 = vsyncadd (%p1385_p11), [#allocation9], 4294963200  ;;  %v1049_v0 = vmov 0.0   ;;  %v274_v1 = vld [vmem:[#allocation5 + $0x8] sm:$0xff]  ;;  %v276_v2 = vld [vmem:[#allocation5 + $0x18] sm:$0xff]  ;;  %vm281_vm0 = vcmask 261120   ;;  %v358_v14 = vlaneseq }
  0x89   : > { %349 = vmatprep.mubr.f32.mxu0 %v1049_v0  ;;  %v273_v3 = vld [vmem:[#allocation5] sm:$0xff]  ;;  %v696_v4 = vpack.c.bf16 %v276_v2, %v274_v1  ;;  %v275_v5 = vld [vmem:[#allocation5 + $0x10] sm:$0xff]  ;;  %v278_v6 = vld [vmem:[#allocation5 + $0x28] sm:$0xff]  ;;  %s658_s23 = sshll.u32 %s1031_s18, 7  ;;  %s271_s25 = scalar_lea.vmem [#allocation10], %s649_s29 }
  0x8a   : > { %v280_v7 = vld [vmem:[#allocation5 + $0x38] sm:$0xff]  ;;  %v698_v8 = vpack.c.bf16 %v275_v5, %v273_v3  ;;  %v277_v10 = vld [vmem:[#allocation5 + $0x20] sm:$0xff]  ;;  %v279_v11 = vld [vmem:[#allocation5 + $0x30] sm:$0xff]  ;;  %v359_v15 = vshrl.u32 %v358_v14, 7  ;;  %v1301_v25 = vand.u32 127, %v358_v14  ;;  %s530_s27 = sshll.u32 %s271_s25, 4  ;;  %s1313_s6 = scalar_lea.hbm %s1366_s4, %s658_s23  ;;  %s1315_s27 = int_to_ptr.vmem [resolvable:$true] %s530_s27 }
  0x8b   : > { %v700_v9 = vpack.c.bf16 %v280_v7, %v278_v6  ;;  %697 = vmatprep.subr.bf16.mxu0 %v696_v4  ;;  %v702_v12 = vpack.c.bf16 %v279_v11, %v277_v10  ;;  %v272_v13 = vld [vmem:[%s235_s9] sm:$0xff]  ;;  %v356_v17 = vld [vmem:[#allocation7] sm:$0x3]  ;;  %v428_v34 = vld [vmem:[#allocation8 + $0x80] sm:$0xff]  ;;  %s516_s14 = scalar_lea.sflag [#allocation4], %s1283_s28  ;;  %s949_s8 = scalar_lea.vmem %s1315_s27, 128 }
  0x8c   : > { %699 = vmatpush1.bf16.msra.mxu0 %v698_v8  ;;  %v364_v16 = vsub.s32 1, %v359_v15  ;;  %v360_v18 = vsub.s32 0, %v359_v15  ;;  %v429_v35 = vld [vmem:[#allocation8 + $0x88] sm:$0xff]  ;;  %v412_v36 = vld [vmem:[#allocation8] sm:$0xff]  ;;  %v430_v39 = vld [vmem:[#allocation8 + $0x90] sm:$0xff]  ;;  %p950_p13 = scmp.ne.s32.totalorder %s1315_s27, %s949_s8  ;;  %s1051_s18 = smov [#allocation10]  }
  0x8d   : > { %701 = vmatprep.subr.bf16.mxu0 %v700_v9  ;;  %v704_v37 = vpack.c.bf16 %v429_v35, %v428_v34  ;;  %v413_v38 = vld [vmem:[#allocation8 + $0x8] sm:$0xff]  ;;  %v431_v40 = vld [vmem:[#allocation8 + $0x98] sm:$0xff]  ;;  %v414_v43 = vld [vmem:[#allocation8 + $0x10] sm:$0xff]  ;;  %s953_s10 = sshll.u32 %s1051_s18, 4  ;;  %s954_s10 = int_to_ptr.vmem [resolvable:$false] %s953_s10 }
  0x8e   : > { %v365_v19 = vrot.slane %v356_v17, %v364_v16  ;;  %v361_v22 = vrot.slane %v356_v17, %v360_v18  ;;  %v706_v41 = vpack.c.bf16 %v413_v38, %v412_v36  ;;  %v708_v42 = vpack.c.bf16 %v431_v40, %v430_v39  ;;  %v415_v44 = vld [vmem:[#allocation8 + $0x18] sm:$0xff]  ;;  %v432_v45 = vld [vmem:[#allocation8 + $0xa0] sm:$0xff]  ;;  %v433_v46 = vld [vmem:[#allocation8 + $0xa8] sm:$0xff]  ;;  %p951_p6 = pnand %p950_p13, %p1228_p10  ;;  %s955_s30 = scalar_lea.vmem %s954_s10, 256 }
  0x8f   : > { %705 = vmatprep.subr.bf16.mxu1 %v704_v37  ;;  %v710_v47 = vpack.c.bf16 %v415_v44, %v414_v43  ;;  %v712_v48 = vpack.c.bf16 %v433_v46, %v432_v45  ;;  %v416_v49 = vld [vmem:[#allocation8 + $0x20] sm:$0xff]  ;;  %v417_v50 = vld [vmem:[#allocation8 + $0x28] sm:$0xff]  ;;  %v434_v51 = vld [vmem:[#allocation8 + $0xb0] sm:$0xff]  ;;  %v1050_v36 = vmov 0.5   ;;  %p956_p5 = scmp.lt.s32.totalorder %s1315_s27, %s954_s10  ;;  %p957_p7 = scmp.lt.s32.totalorder %s955_s30, %s949_s8 }
  0x90   : > { %703 = vmatpush1.bf16.msra.mxu0 %v702_v12  ;;  %707 = vmatpush3.bf16.msra.mxu1 %v706_v41  ;;  %v435_v52 = vld [vmem:[#allocation8 + $0xb8] sm:$0xff]  ;;  %v714_v53 = vpack.c.bf16 %v417_v50, %v416_v49  ;;  %v418_v55 = vld [vmem:[#allocation8 + $0x30] sm:$0xff]  ;;  %v436_v57 = vld [vmem:[#allocation8 + $0xc0] sm:$0xff]  ;;  %p952_p3 = pneg %p951_p6 }
  0x91   : > { %709 = vmatprep.subr.bf16.mxu1 %v708_v42  ;;  %v716_v54 = vpack.c.bf16 %v435_v52, %v434_v51  ;;  %v419_v56 = vld [vmem:[#allocation8 + $0x38] sm:$0xff]  ;;  %v437_v58 = vld [vmem:[#allocation8 + $0xc8] sm:$0xff]  ;;  %v420_v61 = vld [vmem:[#allocation8 + $0x40] sm:$0xff]  ;;  %p958_p9 = por %p957_p7, %p956_p5 }
  0x92   : > { %v718_v59 = vpack.c.bf16 %v419_v56, %v418_v55  ;;  %v720_v60 = vpack.c.bf16 %v437_v58, %v436_v57  ;;  %v421_v62 = vld [vmem:[#allocation8 + $0x48] sm:$0xff]  ;;  %v438_v63 = vld [vmem:[#allocation8 + $0xd0] sm:$0xff]  ;;  %v439_v0 = vld [vmem:[#allocation8 + $0xd8] sm:$0xff] }
  0x93   : > { %654 = vmatmul.mubr.msk.f32.vlgmr.msra.gmra.mrb[0].mxu0 %vm281_vm0, %v272_v13  ;;  %v722_v1 = vpack.c.bf16 %v421_v62, %v420_v61  ;;  %v724_v2 = vpack.c.bf16 %v439_v0, %v438_v63  ;;  %v422_v3 = vld [vmem:[#allocation8 + $0x50] sm:$0xff]  ;;  %v423_v4 = vld [vmem:[#allocation8 + $0x58] sm:$0xff]  ;;  %v440_v14 = vld [vmem:[#allocation8 + $0xe0] sm:$0xff]  ;;  %p959_p0 = pnand %p958_p9, %p952_p3 }
  0x94   : > { %711 = vmatpush3.bf16.msra.mxu1 %v710_v47  ;;  %v726_v5 = vpack.c.bf16 %v423_v4, %v422_v3  ;;  %v441_v15 = vld [vmem:[#allocation8 + $0xe8] sm:$0xff]  ;;  %v424_v17 = vld [vmem:[#allocation8 + $0x60] sm:$0xff] }
  0x95   : > { %713 = vmatprep.subr.bf16.mxu1 %v712_v48  ;;  %v728_v16 = vpack.c.bf16 %v441_v15, %v440_v14  ;;  %v425_v18 = vld [vmem:[#allocation8 + $0x68] sm:$0xff] }
  0x98   : > { %715 = vmatpush3.bf16.msra.mxu1 %v714_v53 }
  0x99   : > { %717 = vmatprep.subr.bf16.mxu1 %v716_v54 }
  0x9c   : > { %719 = vmatpush3.bf16.msra.mxu1 %v718_v59 }
  0x9d   : > { %721 = vmatprep.subr.bf16.mxu1 %v720_v60 }
  0xa0   : > { %723 = vmatpush3.bf16.msra.mxu1 %v722_v1 }
  0xa1   : > { %725 = vmatprep.subr.bf16.mxu1 %v724_v2 }
  0xa4   : > { %727 = vmatpush3.bf16.msra.mxu1 %v726_v5 }
  0xa5   : > { %729 = vmatprep.subr.bf16.mxu1 %v728_v16 }
 0x166   : > { %v351_v20 = vpop.f32.mrb[0].mxu0 }
 0x167   : > { %v353_v21 = vpop.f32.mrb[1].mxu0  ;;  %v368_v24 = vsub.f32 %v361_v22, %v351_v20  ;;  %v442_v20 = vld [vmem:[#allocation8 + $0xf0] sm:$0xff] }
 0x168   : > { %v369_v23 = vsub.f32 %v365_v19, %v353_v21  ;;  %v730_v19 = vpack.c.bf16 %v425_v18, %v424_v17  ;;  %v443_v21 = vld [vmem:[#allocation8 + $0xf8] sm:$0xff] }
 0x169   : > { %v732_v22 = vpack.c.bf16 %v443_v21, %v442_v20 }
 0x16a   : > { %392 = vmin.xlane.f32.xlu0 %v369_v23  ;;  %731 = vmatpush3.bf16.msra.mxu1 %v730_v19 }
 0x16b   : > { %733 = vmatprep.subr.bf16.mxu1 %v732_v22 }
 0x16e   : > { %372 = vmin.xlane.f32.xlu0 %v368_v24 }
 0x1f7   : > { %v393_v26 = vpop.xlane.xlu0 %392 }
 0x1f8   : > { %vm394_vm1 = vcmp.eq.f32.partialorder %v369_v23, %v393_v26  ;;  %v426_v23 = vld [vmem:[#allocation8 + $0x70] sm:$0xff] }
 0x1f9   : > { %v395_v27 = vsel %vm394_vm1, %v1301_v25, 128 }
 0x1fa   : > { %v397_v28 = vshra.s32 %v395_v27, 16  ;;  %v396_v6 = vand.u32 65535, %v395_v27 }
 0x1fb   : > { %v373_v29 = vpop.xlane.xlu0 %372 }
 0x1fc   : > { %vm374_vm2 = vcmp.eq.f32.partialorder %v368_v24, %v373_v29  ;;  %v399_v30 = vcvt.s32.f32 %v397_v28  ;;  %v398_v9 = vcvt.s32.f32 %v396_v6  ;;  %v427_v24 = vld [vmem:[#allocation8 + $0x78] sm:$0xff] }
 0x1fd   : > { %v375_v31 = vsel %vm374_vm2, %v1301_v25, 128  ;;  %v734_v26 = vpack.c.bf16 %v427_v24, %v426_v23 }
 0x1fe   : > { %400 = vmin.xlane.f32.xlu1 %v399_v30  ;;  %v377_v32 = vshra.s32 %v375_v31, 16  ;;  %v376_v7 = vand.u32 65535, %v375_v31 }
 0x1ff   : > { %735 = vmatpush3.bf16.msra.mxu1 %v734_v26 }
 0x200   : > { %v379_v33 = vcvt.s32.f32 %v377_v32  ;;  %v378_v12 = vcvt.s32.f32 %v376_v7 }
 0x202   : > { %380 = vmin.xlane.f32.xlu1 %v379_v33 }
 0x28b   : > { %v401_v8 = vpop.xlane.xlu1 %400 }
 0x28c   : > { %vm402_vm3 = vcmp.eq.f32.partialorder %v399_v30, %v401_v8  ;;  %v407_v27 = vcvt.f32.s32 %v401_v8 }
 0x28d   : > { %v403_v10 = vsel %vm402_vm3, %v398_v9, inf }
 0x28e   : > { %404 = vmin.xlane.f32.xlu0 %v403_v10  ;;  %v408_v29 = vshll.u32 %v407_v27, 16 }
 0x28f   : > { %v381_v11 = vpop.xlane.xlu1 %380 }
 0x290   : > { %vm382_vm4 = vcmp.eq.f32.partialorder %v379_v33, %v381_v11  ;;  %v387_v30 = vcvt.f32.s32 %v381_v11 }
 0x291   : > { %v383_v13 = vsel %vm382_vm4, %v378_v12, inf }
 0x292   : > { %384 = vmin.xlane.f32.xlu1 %v383_v13  ;;  %v388_v34 = vshll.u32 %v387_v30, 16 }
 0x31b   : > { %v405_v28 = vpop.xlane.xlu0 %404 }
 0x31c   : > { %v406_v31 = vcvt.f32.s32 %v405_v28 }
 0x31e   : > { %v409_v32 = vadd.s32 %v408_v29, %v406_v31 }
 0x31f   : > { %v385_v33 = vpop.xlane.xlu1 %384 }
 0x320   : > { %v386_v35 = vcvt.f32.s32 %v385_v33  ;;  %vm410_vm5 = vcmp.eq.s32.totalorder %v1301_v25, %v409_v32 }
 0x321   : > { %655 = vmatprep.mubr.msk.f32.mxu1 %vm410_vm5, %v1050_v36 }
 0x322   : > { %v389_v37 = vadd.s32 %v388_v34, %v386_v35 }
 0x324   : > { %vm390_vm6 = vcmp.eq.s32.totalorder %v1301_v25, %v389_v37 }
 0x325   : > { %656 = vmatmul.mubr.msk.f32.vlgmr.msra.gmra.mrb[0].mxu1 %vm390_vm6, %v1050_v36 }
 0x3f8   : > { %v693_v38 = vpop.f32.mrb[0].mxu1 }
 0x3f9   : > { %v694_v39 = vpop.f32.mrb[1].mxu1 }
 0x3fa   : > { %v695_v40 = vadd.f32 %v694_v39, %v693_v38 }
 0x3fc   : > { %514 = vst [vmem:[%s271_s25] sm:$0xff] %v695_v40 }
 0x3fd   : > { %962 = shalt.err (!%p959_p0)
}
 0x3fe   : > { %s963_s12 = scalar_lea.hbm %s1313_s6, 128  ;;  %s967_s28 = scalar_lea.hbm %s1366_s4, 256 }
 0x3ff   : > { %p964_p4 = scmp.ne.s32.totalorder %s1313_s6, %s963_s12  ;;  %p968_p1 = scmp.lt.u32.totalorder %s1313_s6, %s1366_s4 }
 0x400   : > { %p969_p12 = scmp.lt.u32.totalorder %s967_s28, %s963_s12  ;;  %p971_p13 = scmp.lt.u32.totalorder %s963_s12, %s1313_s6 }
 0x401   : > { %p965_p2 = pnand %p964_p4, %p1228_p10 }
 0x402   : > { %p970_p11 = por %p969_p12, %p968_p1 }
 0x403   : > { %p966_p8 = pneg %p965_p2 }
 0x404   : > { %p972_p6 = por %p971_p13, %p970_p11 }
 0x406   : > { %p973_p3 = pnand %p972_p6, %p966_p8 }
 0x408   : > { %976 = shalt.err (!%p973_p3)
}
 0x409   : > { %750 = dma.vmem_to_hbm [thread:$0]  (%p1228_p10), %s1315_s27, 128, %s1313_s6, %s516_s14  }
 0x40a PF: > { %s1386_s9 = sld [smem:[#allocation15_spill]]  ;;  %s542_s23 = sand.u32 1, %s1019_s15  }
 0x40b   : > { %p1388_p7 = scmp.ge.s32.totalorder %s1039_s20, 2  ;;  %s543_s25 = scalar_lea.sflag [#allocation4], %s542_s23 }
 0x410   : > { %p1387_p5 = scmp.ne.s32.totalorder %s1386_s9, 0 }
 0x412   : > { %p767_p9 = pnand %p1388_p7, %p1387_p5 }
 0x414   : > { %1014 = dma.done.wait (!%p767_p9), %s543_s25, 128  }
 0x415   : > { %1016 = vsyncadd (!%p767_p9), %s543_s25, 4294967168  ;;  %s22_s20 = sadd.s32 1, %s1039_s20   ;;  %s1389_s15 = smov %s1023_s16 }
 0x416   : > { %p19_p0 = scmp.ge.s32.totalorder %s22_s20, 4   ;;  %s1390_s16 = smov %s1027_s17 }
 0x417   : > { %s1391_s17 = smov %s1240_s11  ;;  %s1392_s18 = smov %s1035_s19 }
 0x418   : > { %s1393_s19 = smov %s1395_s5  ;;  %21 = sbr.rel (!%p19_p0) target bundleno = 8 (0x8), region = 93 }
 0x41f   :  { %548 = vsyncpa [#allocation3], 1 }
 0x420   :  { %550 = vsyncpa [#allocation3 + $0x1], 1 }
 0x421   :  { %551 = vsyncpa [#allocation6], 1 }
 0x422   :  { %552 = vsyncpa [#allocation9], 1 }
 0x423   :  { %553 = vsyncpa [#allocation4], 1 }
 0x424   :  { %555 = vsyncpa [#allocation4 + $0x1], 1 }

</bundles_post_ra>
